<compile_context>
chip_gen: v7x
topology: tpu7x:2x2x1
jax: 0.10.0
libtpu: 0.0.40
codegen_flags: <defaults>
</compile_context>

<pallas_src>
import numpy as np
import jax
import jax.numpy as jnp
from jax.experimental import pallas as pl
from jax.experimental.pallas import tpu as pltpu


# --------------------------------------------------------------------------
# Parameter setup (deterministic, in-script)
# --------------------------------------------------------------------------
def dct_matrix(N: int) -> np.ndarray:
    """Ortho-normalized DCT-II matrix: C[k, n] = a_k * cos(pi*(2n+1)*k/(2N))."""
    n = np.arange(N)[None, :]
    k = np.arange(N)[:, None]
    M = np.cos(np.pi * (2 * n + 1) * k / (2.0 * N))
    scale = np.where(k == 0, np.sqrt(1.0 / N), np.sqrt(2.0 / N))
    return (M * scale).astype(np.float32)


BT_TARGET = 8   # samples per grid step; 8 -> kron-expanded operators are 256 wide


def _choose_bt(B: int, target: int = BT_TARGET) -> int:
    """Largest divisor of B that is <= target, keeping grid >= 2 when B >= 2
    (so v7x's two TensorCores both get at least one step)."""
    cap = min(target, B if B < 2 else max(1, B // 2))
    bt = 1
    for d in range(1, cap + 1):
        if B % d == 0:
            bt = d
    return bt


# --------------------------------------------------------------------------
# Fused Pallas kernel: forward 3-D DCT -> mask/gate -> inverse 3-D DCT
# Bt batch samples per grid step; everything stays in VMEM.
# --------------------------------------------------------------------------
def _make_fused_kernel(C: int, approx_recip: bool = True):
    # approx_recip: EUP vrcp (~2^-12 rel. error) on the softmax denominator.
    # Well inside the bf16-operand tolerance; set False for an exact divide.
    if approx_recip:
        inv_fn = lambda d: pl.reciprocal(d, approx=True)
    else:
        inv_fn = lambda d: 1.0 / d

    def kernel(x_ref, lf_ref, rf_ref, wm_ref, li_ref, ri_ref, b_ref, o_ref):
        Bt, TC, HW = x_ref.shape
        # (Bt, TC, HW) -> (Bt*TC, HW): TC=multiple of 8, HW=multiple of 128
        # -> tile-aligned, free.  Rows are batch-major, T-major, C-minor.
        x = x_ref[...].reshape(Bt * TC, HW).astype(jnp.bfloat16)

        # ---- forward spatial DCT (shared intermediate), lane-dense 256-wide --
        xr = jnp.dot(x, rf_ref[...], preferred_element_type=jnp.float32)
        xrb = xr.astype(jnp.bfloat16)

        # ---- temporal forward DCT and fused mask, BOTH from xrb --------------
        # (independent MXU ops on the same operand -> overlap in the pipeline)
        y = jnp.dot(lf_ref[...], xrb, preferred_element_type=jnp.float32)
        # wm = kron(I_Bt, kron(Ct, 1_C w^T)): temporal DCT + Conv3d(C->1)
        # channel contraction + channel broadcast in one matmul.  m is exactly
        # C-replicated along the channel rows.
        m = jnp.dot(wm_ref[...], xrb,
                    preferred_element_type=jnp.float32) + b_ref[0, 0]

        # ---- per-sample gate = relu(m) + (1 - softmax(m over T*H*W)) ---------
        # NOTE: the original module's `sigmoid_pass` applies nn.ReLU (despite
        # the name), so ReLU is intentional.  m is replicated C x along the
        # channel rows -> max is unchanged and the sum is C x the true
        # denominator; multiply by C to recover the exact per-sample softmax.
        m3 = m.reshape(Bt, TC, HW)                       # aligned split, free
        mx = jnp.max(jnp.max(m3, axis=2, keepdims=True), axis=1, keepdims=True)
        ex = jnp.exp(m3 - mx)
        den = jnp.sum(jnp.sum(ex, axis=2, keepdims=True), axis=1, keepdims=True)
        sm = ex * (float(C) * inv_fn(den))               # true softmax value
        g = jnp.maximum(m3, 0.0) + (1.0 - sm)            # (Bt, TC, HW)

        # ---- gate the DCT coefficients ---------------------------------------
        z = (y * g.reshape(Bt * TC, HW)).astype(jnp.bfloat16)

        # ---- inverse 3-D DCT, applied ONCE (linearity of the iDCT) ----------
        zi = jnp.dot(z, ri_ref[...], preferred_element_type=jnp.float32)
        o = jnp.dot(li_ref[...], zi.astype(jnp.bfloat16),
                    preferred_element_type=jnp.float32)
        o_ref[...] = o.reshape(Bt, TC, HW).astype(o_ref.dtype)

    return kernel


def fused_dct_gate_idct(x3, L_fwd, R_fwd, Wm, L_inv, R_inv, bias, *, Bt, C):
    """x3: (B, T*C, H*W) -> (B, T*C, H*W) (output dtype follows input dtype).

    L_fwd/L_inv/Wm are kron(I_Bt, .)-expanded bf16 operators of shape
    (Bt*TC, Bt*TC); R_fwd/R_inv are (HW, HW) bf16; bias is a (1,1) f32 scalar.
    """
    B, TC, HW = x3.shape
    assert B % Bt == 0
    assert L_fwd.shape == (Bt * TC, Bt * TC) == Wm.shape == L_inv.shape
    n_steps = B // Bt
    const2 = lambda g: (0, 0)   # operators: fetched once, stay VMEM-resident
    # (pipeline_mode=pl.Buffered(1) on the constant operators would shave
    #  ~0.6 MiB of double-buffered VMEM; negligible here, so left at default.)
    return pl.pallas_call(
        _make_fused_kernel(C),
        out_shape=jax.ShapeDtypeStruct((B, TC, HW), x3.dtype),
        grid=(n_steps,),
        in_specs=[
            pl.BlockSpec((Bt, TC, HW), lambda g: (g, 0, 0)),   # activation slab
            pl.BlockSpec(L_fwd.shape, const2),                 # kron(I_Bt, Ct ⊗ I_C)   bf16
            pl.BlockSpec(R_fwd.shape, const2),                 # kron(Cs^T, Cs^T)       bf16
            pl.BlockSpec(Wm.shape, const2),                    # kron(I_Bt, Ct ⊗ 1w^T)  bf16
            pl.BlockSpec(L_inv.shape, const2),                 # kron(I_Bt, Ct^T ⊗ I_C) bf16
            pl.BlockSpec(R_inv.shape, const2),                 # kron(Cs, Cs)           bf16
            pl.BlockSpec((1, 1), lambda g: (0, 0),             # Conv3d bias (live)
                         memory_space=pltpu.MemorySpace.SMEM),
        ],
        out_specs=pl.BlockSpec((Bt, TC, HW), lambda g: (g, 0, 0)),
        compiler_params=pltpu.CompilerParams(
            dimension_semantics=("parallel",)),   # batch axis -> both v7x TCs
    )(x3, L_fwd, R_fwd, Wm, L_inv, R_inv, bias)


# --------------------------------------------------------------------------
# Model wrapper
# --------------------------------------------------------------------------
class DCTiDCTWrapper3DPallas:
    """Pallas-TPU equivalent of DCTiDCTWrapper3D.forward."""

    def __init__(self, n_segments, spatial_dim, num_features, key):
        T, S, C = n_segments, spatial_dim, num_features
        self.T, self.S, self.C = T, S, C

        Ct = dct_matrix(T)          # DCT over the temporal axis
        Cs = dct_matrix(S)          # DCT over each spatial axis
        # LinearDCT('dct', ortho) right-multiplies by C^T, 'idct' by C.
        # Spatial (right-side) operators over the flattened (H*W) axis:
        self.R_fwd = jnp.asarray(np.kron(Cs.T, Cs.T), dtype=jnp.bfloat16)
        self.R_inv = jnp.asarray(np.kron(Cs, Cs), dtype=jnp.bfloat16)
        # Temporal (left-side) base operators over the (T*C) axis:
        eye_c = np.eye(C, dtype=np.float32)
        self._L_fwd_base = np.kron(Ct, eye_c)
        self._L_inv_base = np.kron(Ct.T, eye_c)

        # mask_thw = nn.Conv3d(C, 1, kernel_size=1): weight (1,C,1,1,1), bias (1,)
        k1, k2 = jax.random.split(key)
        self.mask_w = (jax.random.normal(k1, (C,)) * 0.1).astype(jnp.float32)
        self.mask_b = (jax.random.normal(k2, (1,)) * 0.1).astype(jnp.float32)
        # Fused mask operator base: kron(Ct, ones(C,1) @ w^T)
        #   = temporal DCT + channel contraction + channel broadcast.
        wb = np.outer(np.ones((C,), np.float32), np.asarray(self.mask_w, np.float32))
        self._Wm_base = np.kron(Ct, wb)

        self._op_cache = {}   # Bt -> (L_fwd, Wm, L_inv) kron(I_Bt, .) expansions

        # f32 DCT matrices kept only for the pure-JAX reference
        self.Ct = jnp.asarray(Ct)
        self.Cs = jnp.asarray(Cs)

    def _ops(self, Bt: int):
        if Bt not in self._op_cache:
            eye_b = np.eye(Bt, dtype=np.float32)
            self._op_cache[Bt] = (
                jnp.asarray(np.kron(eye_b, self._L_fwd_base), dtype=jnp.bfloat16),
                jnp.asarray(np.kron(eye_b, self._Wm_base), dtype=jnp.bfloat16),
                jnp.asarray(np.kron(eye_b, self._L_inv_base), dtype=jnp.bfloat16),
            )
        return self._op_cache[Bt]

    def __call__(self, x):
        BT, C, H, W = x.shape
        T = self.T
        B = BT // T
        Bt = _choose_bt(B)
        L_fwd, Wm, L_inv = self._ops(Bt)
        # (B*T, C, H, W) -> (B, T*C, H*W): a pure reshape, no transpose/HBM pass.
        x3 = x.reshape(B, T * C, H * W)
        out = fused_dct_gate_idct(x3, L_fwd, self.R_fwd, Wm, L_inv, self.R_inv,
                                  self.mask_b.reshape(1, 1).astype(jnp.float32),
                                  Bt=Bt, C=C)
        return out.reshape(BT, C, H, W)


# --------------------------------------------------------------------------
# Pure-JAX f32 reference (follows the original two-path PyTorch forward)
# --------------------------------------------------------------------------
def _ref_forward(x, model):
    BT, C, H, W = x.shape
    T = model.T
    B = BT // T
    x5 = x.reshape(B, T, C, H, W).astype(jnp.float32)
    Ct, Cs = model.Ct, model.Cs

    def sep3(v, At, Ah, Aw):                       # right-multiply W, H, T axes
        v = jnp.einsum('btchw,wx->btchx', v, Aw)
        v = jnp.einsum('btchw,hx->btcxw', v, Ah)
        v = jnp.einsum('btchw,tx->bxchw', v, At)
        return v

    Y = sep3(x5, Ct.T, Cs.T, Cs.T)                                  # forward DCT
    m = jnp.einsum('btchw,c->bthw', Y, model.mask_w) + model.mask_b[0]
    sm = jax.nn.softmax(m.reshape(B, -1), axis=1).reshape(B, T, H, W)
    Z1 = Y * jnp.maximum(m, 0.0)[:, :, None, :, :]   # sigmoid_pass (ReLU in source)
    Z2 = Y * (1.0 - sm)[:, :, None, :, :]            # adaptive_pass2
    O = sep3(Z1, Ct, Cs, Cs) + sep3(Z2, Ct, Cs, Cs)  # two inverse DCTs, summed
    return O.reshape(BT, C, H, W)


if __name__ == "__main__":
    T, C, S = 8, 4, 16                # n_segments, channels, spatial_dim
    key = jax.random.PRNGKey(0)
    kx, kp, kx2 = jax.random.split(key, 3)
    model = DCTiDCTWrapper3DPallas(n_segments=T, spatial_dim=S,
                                   num_features=C, key=kp)

    # bf16 MXU operands (f32 accumulation) on all five operator matmuls
    # -> tolerance looser than a pure-f32 comparison.
    RTOL, ATOL = 3e-2, 4e-2

    # --- small config required by the spec: B=2 -> Bt=1, grid=2 --------------
    B = 2
    x = jax.random.normal(kx, (B * T, C, S, S), dtype=jnp.float32)  # NCHW input
    out = jax.block_until_ready(model(x))
    ref = jax.block_until_ready(_ref_forward(x, model))
    assert out.shape == (B * T, C, S, S)
    assert out.dtype == jnp.float32
    np.testing.assert_allclose(np.asarray(out), np.asarray(ref),
                               rtol=RTOL, atol=ATOL)

    # --- batched config exercising the kron(I_Bt, .) path: B=16 -> Bt=8,
    #     grid=2, all operators 256-wide (fills the MXU) ----------------------
    B2 = 16
    x2 = jax.random.normal(kx2, (B2 * T, C, S, S), dtype=jnp.float32)
    out2 = jax.block_until_ready(model(x2))
    ref2 = jax.block_until_ready(_ref_forward(x2, model))
    assert out2.shape == (B2 * T, C, S, S)
    np.testing.assert_allclose(np.asarray(out2), np.asarray(ref2),
                               rtol=RTOL, atol=ATOL)

    print("KERNEL_OK")
</pallas_src>

<mosaic_0001>
module attributes {stable_mosaic.version = 11 : i64} {
  func.func @kernel(%arg0: i32, %arg1: memref<1x32x256xf32, #tpu.memory_space<vmem>>, %arg2: memref<32x32xbf16, #tpu.memory_space<vmem>>, %arg3: memref<256x256xbf16, #tpu.memory_space<vmem>>, %arg4: memref<32x32xbf16, #tpu.memory_space<vmem>>, %arg5: memref<32x32xbf16, #tpu.memory_space<vmem>>, %arg6: memref<256x256xbf16, #tpu.memory_space<vmem>>, %arg7: memref<1x1xf32, #tpu.memory_space<smem>>, %arg8: memref<1x32x256xf32, #tpu.memory_space<vmem>>) attributes {dimension_semantics = [#tpu.dimension_semantics<parallel>], iteration_bounds = array<i64: 2>, scalar_prefetch = 0 : i64, scratch_operands = 0 : i64, tpu.core_type = #tpu.core_type<tc>, window_params = [{transform_indices = @transform_0, window_bounds = array<i64: 1, 32, 256>}, {pipeline_mode = #tpu.pipeline_mode<synchronous>, transform_indices = @transform_1, window_bounds = array<i64: 32, 32>}, {pipeline_mode = #tpu.pipeline_mode<synchronous>, transform_indices = @transform_2, window_bounds = array<i64: 256, 256>}, {pipeline_mode = #tpu.pipeline_mode<synchronous>, transform_indices = @transform_3, window_bounds = array<i64: 32, 32>}, {pipeline_mode = #tpu.pipeline_mode<synchronous>, transform_indices = @transform_4, window_bounds = array<i64: 32, 32>}, {pipeline_mode = #tpu.pipeline_mode<synchronous>, transform_indices = @transform_5, window_bounds = array<i64: 256, 256>}, {transform_indices = @transform_6, window_bounds = array<i64: 1, 1>}, {transform_indices = @transform_7, window_bounds = array<i64: 1, 32, 256>}]} {
    %c0 = arith.constant 0 : index
    %c0_0 = arith.constant 0 : index
    %c0_1 = arith.constant 0 : index
    %0 = vector.load %arg1[%c0, %c0_0, %c0_1] : memref<1x32x256xf32, #tpu.memory_space<vmem>>, vector<1x32x256xf32>
    %1 = vector.shape_cast %0 : vector<1x32x256xf32> to vector<32x256xf32>
    %2 = arith.truncf %1 : vector<32x256xf32> to vector<32x256xbf16>
    %c0_2 = arith.constant 0 : index
    %c0_3 = arith.constant 0 : index
    %3 = vector.load %arg3[%c0_2, %c0_3] : memref<256x256xbf16, #tpu.memory_space<vmem>>, vector<256x256xbf16>
    %cst = arith.constant dense<0.000000e+00> : vector<32x256xf32>
    %4 = tpu.matmul %2, %3, %cst {dimension_numbers = #tpu.dot_dimension_numbers<[1], [0], [0], [1], [0, 0, 1, 1], [], []>} : vector<32x256xbf16>, vector<256x256xbf16>, vector<32x256xf32> -> vector<32x256xf32>
    %5 = arith.truncf %4 : vector<32x256xf32> to vector<32x256xbf16>
    %c0_4 = arith.constant 0 : index
    %c0_5 = arith.constant 0 : index
    %6 = vector.load %arg2[%c0_4, %c0_5] : memref<32x32xbf16, #tpu.memory_space<vmem>>, vector<32x32xbf16>
    %cst_6 = arith.constant dense<0.000000e+00> : vector<32x256xf32>
    %7 = tpu.matmul %6, %5, %cst_6 {dimension_numbers = #tpu.dot_dimension_numbers<[1], [0], [0], [1], [0, 0, 1, 1], [], []>} : vector<32x32xbf16>, vector<32x256xbf16>, vector<32x256xf32> -> vector<32x256xf32>
    %c0_7 = arith.constant 0 : index
    %c0_8 = arith.constant 0 : index
    %8 = vector.load %arg4[%c0_7, %c0_8] : memref<32x32xbf16, #tpu.memory_space<vmem>>, vector<32x32xbf16>
    %cst_9 = arith.constant dense<0.000000e+00> : vector<32x256xf32>
    %9 = tpu.matmul %8, %5, %cst_9 {dimension_numbers = #tpu.dot_dimension_numbers<[1], [0], [0], [1], [0, 0, 1, 1], [], []>} : vector<32x32xbf16>, vector<32x256xbf16>, vector<32x256xf32> -> vector<32x256xf32>
    %c0_10 = arith.constant 0 : index
    %c0_11 = arith.constant 0 : index
    %10 = memref.load %arg7[%c0_10, %c0_11] : memref<1x1xf32, #tpu.memory_space<smem>>
    %11 = vector.broadcast %10 : f32 to vector<32x256xf32>
    %12 = arith.addf %9, %11 : vector<32x256xf32>
    %13 = vector.shape_cast %12 : vector<32x256xf32> to vector<1x32x256xf32>
    %cst_12 = arith.constant dense<0xFF800000> : vector<1x32xf32>
    %14 = vector.multi_reduction <maximumf>, %13, %cst_12 [2] : vector<1x32x256xf32> to vector<1x32xf32>
    %15 = vector.shape_cast %14 : vector<1x32xf32> to vector<1x32x1xf32>
    %cst_13 = arith.constant dense<0xFF800000> : vector<1x1xf32>
    %16 = vector.multi_reduction <maximumf>, %15, %cst_13 [1] : vector<1x32x1xf32> to vector<1x1xf32>
    %17 = vector.shape_cast %16 : vector<1x1xf32> to vector<1x1x1xf32>
    %18 = vector.broadcast %17 : vector<1x1x1xf32> to vector<1x32x256xf32>
    %19 = arith.subf %13, %18 : vector<1x32x256xf32>
    %20 = math.exp %19 : vector<1x32x256xf32>
    %cst_14 = arith.constant dense<0.000000e+00> : vector<1x32xf32>
    %21 = vector.multi_reduction <add>, %20, %cst_14 [2] : vector<1x32x256xf32> to vector<1x32xf32>
    %22 = vector.shape_cast %21 : vector<1x32xf32> to vector<1x32x1xf32>
    %cst_15 = arith.constant dense<0.000000e+00> : vector<1x1xf32>
    %23 = vector.multi_reduction <add>, %22, %cst_15 [1] : vector<1x32x1xf32> to vector<1x1xf32>
    %24 = vector.shape_cast %23 : vector<1x1xf32> to vector<1x1x1xf32>
    %25 = tpu.reciprocal %24 {approx = true} : vector<1x1x1xf32> -> vector<1x1x1xf32>
    %cst_16 = arith.constant 4.000000e+00 : f32
    %26 = vector.broadcast %cst_16 : f32 to vector<1x1x1xf32>
    %27 = arith.mulf %26, %25 : vector<1x1x1xf32>
    %28 = vector.broadcast %27 : vector<1x1x1xf32> to vector<1x32x256xf32>
    %29 = arith.mulf %20, %28 : vector<1x32x256xf32>
    %cst_17 = arith.constant 0.000000e+00 : f32
    %30 = vector.broadcast %cst_17 : f32 to vector<1x32x256xf32>
    %31 = arith.maximumf %13, %30 : vector<1x32x256xf32>
    %cst_18 = arith.constant 1.000000e+00 : f32
    %32 = vector.broadcast %cst_18 : f32 to vector<1x32x256xf32>
    %33 = arith.subf %32, %29 : vector<1x32x256xf32>
    %34 = arith.addf %31, %33 : vector<1x32x256xf32>
    %35 = vector.shape_cast %34 : vector<1x32x256xf32> to vector<32x256xf32>
    %36 = arith.mulf %7, %35 : vector<32x256xf32>
    %37 = arith.truncf %36 : vector<32x256xf32> to vector<32x256xbf16>
    %c0_19 = arith.constant 0 : index
    %c0_20 = arith.constant 0 : index
    %38 = vector.load %arg6[%c0_19, %c0_20] : memref<256x256xbf16, #tpu.memory_space<vmem>>, vector<256x256xbf16>
    %cst_21 = arith.constant dense<0.000000e+00> : vector<32x256xf32>
    %39 = tpu.matmul %37, %38, %cst_21 {dimension_numbers = #tpu.dot_dimension_numbers<[1], [0], [0], [1], [0, 0, 1, 1], [], []>} : vector<32x256xbf16>, vector<256x256xbf16>, vector<32x256xf32> -> vector<32x256xf32>
    %c0_22 = arith.constant 0 : index
    %c0_23 = arith.constant 0 : index
    %40 = vector.load %arg5[%c0_22, %c0_23] : memref<32x32xbf16, #tpu.memory_space<vmem>>, vector<32x32xbf16>
    %41 = arith.truncf %39 : vector<32x256xf32> to vector<32x256xbf16>
    %cst_24 = arith.constant dense<0.000000e+00> : vector<32x256xf32>
    %42 = tpu.matmul %40, %41, %cst_24 {dimension_numbers = #tpu.dot_dimension_numbers<[1], [0], [0], [1], [0, 0, 1, 1], [], []>} : vector<32x32xbf16>, vector<32x256xbf16>, vector<32x256xf32> -> vector<32x256xf32>
    %43 = vector.shape_cast %42 : vector<32x256xf32> to vector<1x32x256xf32>
    %c0_25 = arith.constant 0 : index
    %c0_26 = arith.constant 0 : index
    %c0_27 = arith.constant 0 : index
    %44 = vector.load %arg8[%c0_25, %c0_26, %c0_27] : memref<1x32x256xf32, #tpu.memory_space<vmem>>, vector<1x32x256xf32>
    tpu.vector_store %arg8[%c0_25, %c0_26, %c0_27], %43 {strides = array<i32>} : memref<1x32x256xf32, #tpu.memory_space<vmem>>, vector<1x32x256xf32>,
    return
  }
  func.func @transform_0(%arg0: i32) -> (i32, i32, i32) {
    %c0_i32 = arith.constant 0 : i32
    %c0_i32_0 = arith.constant 0 : i32
    %c0_i32_1 = arith.constant 0 : i32
    return %arg0, %c0_i32, %c0_i32_0 : i32, i32, i32
  }
  func.func @transform_1(%arg0: i32) -> (i32, i32) {
    %c0_i32 = arith.constant 0 : i32
    %c0_i32_0 = arith.constant 0 : i32
    %c0_i32_1 = arith.constant 0 : i32
    return %c0_i32, %c0_i32_0 : i32, i32
  }
  func.func @transform_2(%arg0: i32) -> (i32, i32) {
    %c0_i32 = arith.constant 0 : i32
    %c0_i32_0 = arith.constant 0 : i32
    %c0_i32_1 = arith.constant 0 : i32
    return %c0_i32, %c0_i32_0 : i32, i32
  }
  func.func @transform_3(%arg0: i32) -> (i32, i32) {
    %c0_i32 = arith.constant 0 : i32
    %c0_i32_0 = arith.constant 0 : i32
    %c0_i32_1 = arith.constant 0 : i32
    return %c0_i32, %c0_i32_0 : i32, i32
  }
  func.func @transform_4(%arg0: i32) -> (i32, i32) {
    %c0_i32 = arith.constant 0 : i32
    %c0_i32_0 = arith.constant 0 : i32
    %c0_i32_1 = arith.constant 0 : i32
    return %c0_i32, %c0_i32_0 : i32, i32
  }
  func.func @transform_5(%arg0: i32) -> (i32, i32) {
    %c0_i32 = arith.constant 0 : i32
    %c0_i32_0 = arith.constant 0 : i32
    %c0_i32_1 = arith.constant 0 : i32
    return %c0_i32, %c0_i32_0 : i32, i32
  }
  func.func @transform_6(%arg0: i32) -> (i32, i32) {
    %c0_i32 = arith.constant 0 : i32
    %c0_i32_0 = arith.constant 0 : i32
    %c0_i32_1 = arith.constant 0 : i32
    return %c0_i32, %c0_i32_0 : i32, i32
  }
  func.func @transform_7(%arg0: i32) -> (i32, i32, i32) {
    %c0_i32 = arith.constant 0 : i32
    %c0_i32_0 = arith.constant 0 : i32
    %c0_i32_1 = arith.constant 0 : i32
    return %arg0, %c0_i32, %c0_i32_0 : i32, i32, i32
  }
}

</mosaic_0001>

<bundles_post_ra>
// kernel: tpu_custom_call.1
= control target key start
LH: loop header
LB: loop body
LE: loop exit
PB: predicated region body
PF: predicated region fallthrough
CT: control target
= control target key end

     0   :  { %s2331_s0 = inlined_call_operand.hbm [shape: f32[2,32,256], index: 0, kind: input, shape index: {}]   ;;  %s2332_s1 = inlined_call_operand.hbm [shape: bf16[32,32], index: 1, kind: input, shape index: {}]   ;;  %s2333_s2 = inlined_call_operand.hbm [shape: bf16[256,256], index: 2, kind: input, shape index: {}]   ;;  %s2334_s3 = inlined_call_operand.hbm [shape: bf16[32,32], index: 3, kind: input, shape index: {}]   ;;  %s2335_s4 = inlined_call_operand.vmem [shape: bf16[32,32], index: 4, kind: input, shape index: {}]   ;;  %s2336_s5 = inlined_call_operand.hbm [shape: bf16[256,256], index: 5, kind: input, shape index: {}]   ;;  %s2337_s6 = inlined_call_operand.<no memory space> [shape: f32[1,1], index: 6, kind: input, shape index: {}]   ;;  %s2338_s7 = inlined_call_operand.hbm [shape: f32[2,32,256], index: 7, kind: output, shape index: {}]  }
   0x1   :  { %12 = sst [smem:[#allocation2]] %s2337_s6 }
   0x2   :  { %13 = vsyncpa [#allocation4], 0 }
   0x3   :  { %15 = vsyncpa [#allocation4 + $0x1], 0 }
   0x4   :  { %16 = vsyncpa [#allocation7], 0 }
   0x5   :  { %17 = vsyncpa [#allocation10], 0 }
   0x6   :  { %18 = vsyncpa [#allocation5], 0 }
   0x7   :  { %20 = vsyncpa [#allocation5 + $0x1], 0  ;;  %s1926_s26 = smov 0   ;;  %s1928_s27 = smov 0  }
   0x8   :  { %s1930_s28 = smov 0   ;;  %s1932_s29 = smov 0  }
   0x9 LB: > { %s1947_s6 = sadd.s32 4294967295, %s1866_s29   ;;  %s1334_s30 = sadd.s32 4294967294, %s1866_s29   ;;  %s1866_s29 = sphi %s1932_s29, %s2361_s29   ;;  %s1862_s28 = sphi %s1930_s28, %s2360_s28   ;;  %s1858_s27 = sphi %s1928_s27, %s2359_s27   ;;  %s1854_s26 = sphi %s1926_s26, %s2358_s26  }
   0xa   : > { %p46_p0 = scmp.ne.s32.totalorder %s1858_s27, %s1854_s26  ;;  %p2339_p1 = scmp.eq.s32.totalorder %s1947_s6, 0 }
   0xb   : > { %p202_p3 = scmp.eq.s32.totalorder %s1334_s30, 1  ;;  %p1335_p5 = scmp.ge.s32.totalorder %s1866_s29, 1 }
   0xc   : > { %p1956_p4 = por %p2339_p1, %p46_p0  ;;  %p209_p7 = scmp.lt.s32.totalorder %s1866_s29, 3 }
   0xd   : > { %p1961_p6 = por %p202_p3, %p46_p0  ;;  %s1868_s11 = smov [#allocation6]  }
   0xe   : > { %s2342_s8 = scalar_select %p1956_p4, 1, 0 }
   0xf   : > { %s2343_s9 = scalar_select %p1961_p6, 1, 0 }
  0x10   : > { %p1966_p8 = pnand %p1335_p5, %p209_p7  ;;  %s221_s12 = sshll.u32 %s1868_s11, 4  ;;  %s1970_s12 = int_to_ptr.vmem [resolvable:$true] %s221_s12 }
  0x11   : > { %s1869_s14 = smov [#allocation9]   ;;  %s1870_s16 = smov [#allocation8]  }
  0x12   : > { %s2344_s10 = scalar_select %p1966_p8, 1, 0 }
  0x13   : > { %p1454_p9 = pneg %p1966_p8  ;;  %s247_s15 = sshll.u32 %s1869_s14, 4  ;;  %s1981_s15 = int_to_ptr.vmem [resolvable:$true] %s247_s15 }
  0x14   : > { %s1983_s17 = sshll.u32 %s1870_s16, 4  ;;  %s1650_s20 = scalar_lea.hbm %s2332_s1, 256  ;;  %s235_s17 = int_to_ptr.vmem [resolvable:$true] %s1983_s17 }
  0x15   : > { %p1977_p11 = pnand %p1454_p9, %p2339_p1  ;;  %p1651_p12 = scmp.ne.s32.totalorder %s2332_s1, %s1650_s20 }
  0x16   : > { %p1657_p5 = scmp.lt.u32.totalorder %s1650_s20, %s2332_s1 }
  0x17   : > { %p1993_p13 = pneg %p1977_p11 }
  0x19   : > { %p1653_p0 = pnand %p1993_p13, %p1651_p12 }
  0x1b   : > { %p1654_p3 = pneg %p1653_p0 }
  0x1d   : > { %p1659_p7 = pnand %p1657_p5, %p1654_p3 }
  0x1f   : > { %1662 = shalt.err (!%p1659_p7)
}
  0x20   : > { %s1663_s30 = scalar_lea.vmem %s1970_s12, 256  ;;  %p1671_p2 = scmp.lt.s32.totalorder %s1970_s12, %s1970_s12 }
  0x21   : > { %p1664_p9 = scmp.ne.s32.totalorder %s1970_s12, %s1663_s30  ;;  %p1672_p6 = scmp.lt.s32.totalorder %s1663_s30, %s1663_s30 }
  0x23   : > { %p1666_p10 = pnand %p1664_p9, %p1993_p13  ;;  %p1673_p12 = por %p1672_p6, %p1671_p2 }
  0x25   : > { %p1667_p1 = pneg %p1666_p10 }
  0x27   : > { %p1674_p0 = pnand %p1673_p12, %p1667_p1 }
  0x29   : > { %1677 = shalt.err (!%p1674_p0)
}
  0x2a   : > { %s1871_s11 = smov 64   ;;  %s1872_s14 = smov 4  }
  0x2b   : > { %1457 = dma.hbm_to_vmem [thread:$0]  (!%p1977_p11), %s2332_s1, 256, %s1970_s12, [#allocation7], %s1871_s11, %s1871_s11, %s1872_s14  }
  0x2c   : > { %s1678_s21 = scalar_lea.hbm %s2334_s3, 256 }
  0x2d   : > { %p1679_p2 = scmp.ne.s32.totalorder %s2334_s3, %s1678_s21  ;;  %p1685_p10 = scmp.lt.u32.totalorder %s1678_s21, %s2334_s3 }
  0x2f   : > { %p1681_p1 = pnand %p1679_p2, %p1993_p13 }
  0x31   : > { %p1682_p6 = pneg %p1681_p1 }
  0x33   : > { %p1687_p3 = pnand %p1685_p10, %p1682_p6 }
  0x35   : > { %1690 = shalt.err (!%p1687_p3)
}
  0x36   : > { %s1691_s12 = scalar_lea.vmem %s1981_s15, 256  ;;  %p1699_p12 = scmp.lt.s32.totalorder %s1981_s15, %s1981_s15 }
  0x37   : > { %p1692_p5 = scmp.ne.s32.totalorder %s1981_s15, %s1691_s12  ;;  %p1700_p0 = scmp.lt.s32.totalorder %s1691_s12, %s1691_s12 }
  0x39   : > { %p1694_p7 = pnand %p1692_p5, %p1993_p13  ;;  %p1701_p2 = por %p1700_p0, %p1699_p12 }
  0x3b   : > { %p1695_p9 = pneg %p1694_p7 }
  0x3d   : > { %p1702_p1 = pnand %p1701_p2, %p1695_p9 }
  0x3f   : > { %1705 = shalt.err (!%p1702_p1)
}
  0x40   : > { %1463 = dma.hbm_to_vmem [thread:$0]  (!%p1977_p11), %s2334_s3, 256, %s1981_s15, [#allocation10], %s1871_s11, %s1871_s11, %s1872_s14  }
  0x41   : > { %s1706_s21 = scalar_lea.hbm %s2333_s2, 4096 }
  0x42   : > { %p1707_p6 = scmp.ne.s32.totalorder %s2333_s2, %s1706_s21  ;;  %p1713_p5 = scmp.lt.u32.totalorder %s1706_s21, %s2333_s2 }
  0x44   : > { %p1709_p10 = pnand %p1707_p6, %p1993_p13 }
  0x46   : > { %p1710_p3 = pneg %p1709_p10 }
  0x48   : > { %p1715_p7 = pnand %p1713_p5, %p1710_p3 }
  0x4a   : > { %1718 = shalt.err (!%p1715_p7)
}
  0x4b   : > { %s1719_s12 = scalar_lea.vmem %s235_s17, 4096  ;;  %p1727_p2 = scmp.lt.s32.totalorder %s235_s17, %s235_s17 }
  0x4c   : > { %p1720_p9 = scmp.ne.s32.totalorder %s235_s17, %s1719_s12  ;;  %p1728_p1 = scmp.lt.s32.totalorder %s1719_s12, %s1719_s12 }
  0x4e   : > { %p1722_p12 = pnand %p1720_p9, %p1993_p13  ;;  %p1729_p4 = por %p1728_p1, %p1727_p2 }
  0x50   : > { %p1723_p0 = pneg %p1722_p12 }
  0x52   : > { %p1730_p8 = pnand %p1729_p4, %p1723_p0 }
  0x54   : > { %1733 = shalt.err (!%p1730_p8)
}
  0x55   : > { %s1873_s15 = smov 128   ;;  %s1874_s11 = smov 8  }
  0x56   : > { %1460 = dma.hbm_to_vmem [thread:$0]  (!%p1977_p11), %s2333_s2, 4096, %s235_s17, [#allocation7], %s1873_s15, %s1873_s15, %s1874_s11  }
  0x57   : > { %s1875_s18 = smov [#allocation11]   ;;  %s1734_s22 = scalar_lea.hbm %s2336_s5, 4096 }
  0x58   : > { %s263_s19 = sshll.u32 %s1875_s18, 4  ;;  %p1735_p4 = scmp.ne.s32.totalorder %s2336_s5, %s1734_s22  ;;  %s264_s19 = int_to_ptr.vmem [resolvable:$true] %s263_s19 }
  0x59   : > { %p1741_p10 = scmp.lt.u32.totalorder %s1734_s22, %s2336_s5 }
  0x5a   : > { %p1737_p8 = pnand %p1735_p4, %p1993_p13 }
  0x5c   : > { %p1738_p6 = pneg %p1737_p8 }
  0x5e   : > { %p1743_p3 = pnand %p1741_p10, %p1738_p6 }
  0x60   : > { %1746 = shalt.err (!%p1743_p3)
}
  0x61   : > { %s1747_s17 = scalar_lea.vmem %s264_s19, 4096  ;;  %p1755_p12 = scmp.lt.s32.totalorder %s264_s19, %s264_s19 }
  0x62   : > { %p1748_p5 = scmp.ne.s32.totalorder %s264_s19, %s1747_s17  ;;  %p1756_p0 = scmp.lt.s32.totalorder %s1747_s17, %s1747_s17 }
  0x64   : > { %p1750_p7 = pnand %p1748_p5, %p1993_p13  ;;  %p1757_p2 = por %p1756_p0, %p1755_p12 }
  0x66   : > { %p1751_p9 = pneg %p1750_p7 }
  0x68   : > { %p1758_p1 = pnand %p1757_p2, %p1751_p9 }
  0x6a   : > { %1761 = shalt.err (!%p1758_p1)
}
  0x6b   : > { %1466 = dma.hbm_to_vmem [thread:$0]  (!%p1977_p11), %s2336_s5, 4096, %s264_s19, [#allocation10], %s1873_s15, %s1873_s15, %s1874_s11  }
  0x6c   : > { %s2075_s23 = sadd.s32 1, %s1866_s29   ;;  %s33_s18 = sadd.s32 1, %s1862_s28 }
  0x6d   : > { %s30_s13 = ssub.s32 %s1866_s29, %s2075_s23  ;;  %p40_p13 = scmp.ne.s32.totalorder %s1862_s28, %s1858_s27 }
  0x6e   : > { %p31_p4 = scmp.eq.s32.totalorder %s30_s13, 0  ;;  %p41_p8 = scmp.eq.s32.totalorder %s1866_s29, 0 }
  0x6f   : > { %p2347_p6 = scmp.eq.s32.totalorder %s1947_s6, 1  ;;  %p1479_p3 = scmp.lt.s32.totalorder %s1866_s29, 2 }
  0x70   : > { %s2091_s21 = scalar_select %p31_p4, %s1862_s28, %s33_s18  }
  0x71   : > { %p2085_p10 = por %p2347_p6, %p40_p13  ;;  %p42_p5 = por %p41_p8, %p40_p13 }
  0x72   : > { %s280_s22 = sand.u32 1, %s1862_s28   ;;  %s1432_s15 = sshll.u32 %s1866_s29, 10 }
  0x73   : > { %s1341_s24 = sshll.u32 %s280_s22, 6  ;;  %s2098_s25 = scalar_lea.hbm %s2331_s0, %s1432_s15 }
  0x74   : > { %s284_s30 = scalar_lea.vmem [#allocation3], %s1341_s24  ;;  %p2102_p11 = pnand %p1479_p3, %p42_p5 }
  0x75   : > { %s291_s12 = sshll.u32 %s284_s30, 4  ;;  %s2106_s14 = scalar_lea.sflag [#allocation4], %s280_s22  ;;  %s2100_s12 = int_to_ptr.vmem [resolvable:$true] %s291_s12 }
  0x76   : > { %s1762_s16 = scalar_lea.hbm %s2098_s25, 1024  ;;  %p1764_p9 = pneg %p2102_p11 }
  0x77   : > { %p1763_p7 = scmp.ne.s32.totalorder %s2098_s25, %s1762_s16  ;;  %s1767_s24 = scalar_lea.hbm %s2331_s0, 2048 }
  0x78   : > { %p1768_p2 = scmp.lt.u32.totalorder %s2098_s25, %s2331_s0  ;;  %p1769_p1 = scmp.lt.u32.totalorder %s1767_s24, %s1762_s16 }
  0x79   : > { %p1765_p12 = pnand %p1764_p9, %p1763_p7  ;;  %p1771_p4 = scmp.lt.u32.totalorder %s1762_s16, %s2098_s25 }
  0x7a   : > { %p1770_p13 = por %p1769_p1, %p1768_p2 }
  0x7b   : > { %p1766_p0 = pneg %p1765_p12 }
  0x7c   : > { %p1772_p8 = por %p1771_p4, %p1770_p13 }
  0x7e   : > { %p1773_p6 = pnand %p1772_p8, %p1766_p0 }
  0x80   : > { %1776 = shalt.err (!%p1773_p6)
}
  0x81   : > { %s1777_s22 = scalar_lea.vmem %s2100_s12, 1024  ;;  %s1876_s19 = smov [#allocation3]  }
  0x82   : > { %p1778_p3 = scmp.ne.s32.totalorder %s2100_s12, %s1777_s22  ;;  %s1782_s30 = sshll.u32 %s1876_s19, 4  ;;  %s1783_s30 = int_to_ptr.vmem [resolvable:$false] %s1782_s30 }
  0x83   : > { %s1784_s18 = scalar_lea.vmem %s1783_s30, 2048  ;;  %p1785_p12 = scmp.lt.s32.totalorder %s2100_s12, %s1783_s30 }
  0x84   : > { %p1780_p5 = pnand %p1778_p3, %p1764_p9  ;;  %p1786_p2 = scmp.lt.s32.totalorder %s1784_s18, %s1777_s22 }
  0x86   : > { %p1781_p7 = pneg %p1780_p5  ;;  %p1787_p1 = por %p1786_p2, %p1785_p12 }
  0x88   : > { %p1788_p13 = pnand %p1787_p1, %p1781_p7 }
  0x8a   : > { %1791 = shalt.err (!%p1788_p13)
}
  0x8b   : > { %s1877_s16 = smov 256   ;;  %s1878_s13 = smov 16  }
  0x8c   : > { %1470 = dma.hbm_to_vmem [thread:$0]  (!%p2102_p11), %s2098_s25, 1024, %s2100_s12, %s2106_s14, %s1877_s16, %s1877_s16, %s1878_s13  }
  0x8d   : > { %p2350_p9 = scmp.ne.s32.totalorder %s2344_s10, 0 }
  0x8e   : > { %s2137_s24 = sand.u32 (!%p2350_p9), 1, %s1858_s27   ;;  %p2351_p0 = scmp.ne.s32.totalorder (!%p2350_p9), %s2342_s8, 0 }
  0x8f   : > { %303 = sbr.rel (%p2350_p9) target bundleno = 1528 (0x5f8), region = 48  ;;  %s1345_s15 = sshll.u32 (!%p2350_p9), %s2137_s24, 6 }
  0x90   : > { %s306_s11 = scalar_lea.sflag (!%p2350_p9), [#allocation4], %s2137_s24  ;;  %s2143_s22 = scalar_lea.vmem (!%p2350_p9), [#allocation3], %s1345_s15 }
  0x96   : > { %1837 = dma.done.wait (%p2351_p0), %s306_s11, 1024  }
  0x97   : > { %1839 = vsyncadd (%p2351_p0), %s306_s11, 4294966272  ;;  %p2352_p11 = scmp.eq.s32.totalorder %s1947_s6, 0 }
  0x99   : > { %1841 = dma.done.wait (%p2352_p11), [#allocation7], 4352   ;;  %p2353_p4 = pmov %p2352_p11 }
  0x9b   : > { %1843 = vsyncadd (%p2353_p4), [#allocation7], 4294962944  ;;  %p2354_p8 = pmov %p2353_p4 }
  0x9c   : > { %p2355_p6 = pmov %p2353_p4 }
  0x9d   : > { %1845 = dma.done.wait (%p2354_p8), [#allocation10], 4352  }
  0x9e   : > { %1847 = vsyncadd (%p2355_p6), [#allocation10], 4294962944  ;;  %v1530_v0 = vld [vmem:[#allocation8 + $0x4] ss:$8 sps:$4 sm:$0xff]   ;;  %v1532_v1 = vld [vmem:[#allocation8] ss:$8 sps:$4 sm:$0xff]  }
  0x9f   : > { %561 = vmatprep.subr.bf16.mxu0 %v1530_v0  ;;  %v1533_v2 = vld [vmem:[#allocation8 + $0x14] ss:$8 sps:$4 sm:$0xff]   ;;  %v1535_v3 = vld [vmem:[#allocation8 + $0x10] ss:$8 sps:$4 sm:$0xff]   ;;  %v1536_v4 = vld [vmem:[#allocation8 + $0x24] ss:$8 sps:$4 sm:$0xff]  }
  0xa0   : > { %562 = vmatpush1.bf16.msra.mxu0 %v1532_v1  ;;  %v1538_v5 = vld [vmem:[#allocation8 + $0x20] ss:$8 sps:$4 sm:$0xff]   ;;  %v1539_v6 = vld [vmem:[#allocation8 + $0x34] ss:$8 sps:$4 sm:$0xff]   ;;  %v1541_v7 = vld [vmem:[#allocation8 + $0x30] ss:$8 sps:$4 sm:$0xff]  }
  0xa1   : > { %563 = vmatprep.subr.bf16.mxu0 %v1533_v2  ;;  %v1542_v8 = vld [vmem:[#allocation8 + $0x44] ss:$8 sps:$4 sm:$0xff]   ;;  %v1544_v9 = vld [vmem:[#allocation8 + $0x40] ss:$8 sps:$4 sm:$0xff]   ;;  %v1545_v10 = vld [vmem:[#allocation8 + $0x54] ss:$8 sps:$4 sm:$0xff]  }
  0xa2   : > { %v1547_v11 = vld [vmem:[#allocation8 + $0x50] ss:$8 sps:$4 sm:$0xff]   ;;  %v1548_v12 = vld [vmem:[#allocation8 + $0x64] ss:$8 sps:$4 sm:$0xff]   ;;  %v1550_v16 = vld [vmem:[#allocation8 + $0x60] ss:$8 sps:$4 sm:$0xff]  }
  0xa3   : > { %v358_v13 = vld [vmem:[%s2143_s22 + $0x8] sm:$0xff]  ;;  %v360_v14 = vld [vmem:[%s2143_s22 + $0x18] sm:$0xff]  ;;  %v357_v35 = vld [vmem:[%s2143_s22] sm:$0xff]  ;;  %v1879_v44 = vmov 0   ;;  %vm632_vm0 = vcmask 261120   ;;  %s696_s8 = sld [smem:[#allocation2]] }
  0xa4   : > { %564 = vmatpush1.bf16.msra.mxu0 %v1535_v3  ;;  %v366_v15 = vpack.c.bf16 %v360_v14, %v358_v13  ;;  %v1551_v17 = vld [vmem:[#allocation8 + $0x74] ss:$8 sps:$4 sm:$0xff]   ;;  %v1553_v18 = vld [vmem:[#allocation8 + $0x70] ss:$8 sps:$4 sm:$0xff]   ;;  %v1554_v19 = vld [vmem:[#allocation8 + $0x84] ss:$8 sps:$4 sm:$0xff]   ;;  %671 = vmatprep.mubr.bf16.mxu1 %v1879_v44 }
  0xa5   : > { %565 = vmatprep.subr.bf16.mxu0 %v1536_v4  ;;  %v1556_v20 = vld [vmem:[#allocation8 + $0x80] ss:$8 sps:$4 sm:$0xff]   ;;  %v1557_v21 = vld [vmem:[#allocation8 + $0x94] ss:$8 sps:$4 sm:$0xff]   ;;  %v1559_v22 = vld [vmem:[#allocation8 + $0x90] ss:$8 sps:$4 sm:$0xff]  }
  0xa6   : > { %593 = vmatprep.mubr.bf16.mxu0 %v366_v15  ;;  %v1560_v23 = vld [vmem:[#allocation8 + $0xa4] ss:$8 sps:$4 sm:$0xff]   ;;  %v1562_v24 = vld [vmem:[#allocation8 + $0xa0] ss:$8 sps:$4 sm:$0xff]   ;;  %v1563_v25 = vld [vmem:[#allocation8 + $0xb4] ss:$8 sps:$4 sm:$0xff]  }
  0xa7   : > { %v1565_v26 = vld [vmem:[#allocation8 + $0xb0] ss:$8 sps:$4 sm:$0xff]   ;;  %v1566_v27 = vld [vmem:[#allocation8 + $0xc4] ss:$8 sps:$4 sm:$0xff]   ;;  %v1568_v28 = vld [vmem:[#allocation8 + $0xc0] ss:$8 sps:$4 sm:$0xff]  }
  0xa8   : > { %566 = vmatpush1.bf16.msra.mxu0 %v1538_v5  ;;  %v1569_v29 = vld [vmem:[#allocation8 + $0xd4] ss:$8 sps:$4 sm:$0xff]   ;;  %v1571_v30 = vld [vmem:[#allocation8 + $0xd0] ss:$8 sps:$4 sm:$0xff]   ;;  %v1572_v31 = vld [vmem:[#allocation8 + $0xe4] ss:$8 sps:$4 sm:$0xff]  }
  0xa9   : > { %567 = vmatprep.subr.bf16.mxu0 %v1539_v6  ;;  %v1574_v32 = vld [vmem:[#allocation8 + $0xe0] ss:$8 sps:$4 sm:$0xff]   ;;  %v1575_v33 = vld [vmem:[#allocation8 + $0xf4] ss:$8 sps:$4 sm:$0xff]   ;;  %v1577_v34 = vld [vmem:[#allocation8 + $0xf0] ss:$8 sps:$4 sm:$0xff]   ;;  %v697_v5 = vstv %s696_s8 }
  0xaa   : > { %v359_v36 = vld [vmem:[%s2143_s22 + $0x10] sm:$0xff]  ;;  %v362_v37 = vld [vmem:[%s2143_s22 + $0x28] sm:$0xff]  ;;  %v364_v38 = vld [vmem:[%s2143_s22 + $0x38] sm:$0xff]  ;;  %s355_s14 = scalar_lea.vmem [#allocation12], %s1345_s15  ;;  %s1433_s30 = sshll.u32 %s1947_s6, 10 }
  0xab   : > { %v365_v39 = vpack.c.bf16 %v359_v36, %v357_v35  ;;  %v368_v40 = vpack.c.bf16 %v364_v38, %v362_v37  ;;  %v361_v41 = vld [vmem:[%s2143_s22 + $0x20] sm:$0xff]  ;;  %v363_v42 = vld [vmem:[%s2143_s22 + $0x30] sm:$0xff]  ;;  %v1579_v58 = vld [vmem:[#allocation6 + $0x8] sm:$0xff]   ;;  %s1223_s19 = sshll.u32 %s355_s14, 4  ;;  %s2287_s13 = scalar_lea.hbm %s2338_s7, %s1433_s30  ;;  %s2282_s19 = int_to_ptr.vmem [resolvable:$true] %s1223_s19 }
  0xac   : > { %568 = vmatpush1.bf16.msra.mxu0 %v1541_v7  ;;  %v367_v43 = vpack.c.bf16 %v363_v42, %v361_v41  ;;  %v1578_v57 = vld [vmem:[#allocation6] sm:$0xff]   ;;  %v1580_v59 = vld [vmem:[#allocation9] sm:$0xff]   ;;  %v1581_v60 = vld [vmem:[#allocation9 + $0x8] sm:$0xff]   ;;  %s1210_s15 = scalar_lea.sflag [#allocation5], %s2137_s24  ;;  %s1792_s6 = scalar_lea.vmem %s2282_s19, 1024 }
  0xad   : > { %569 = vmatprep.subr.bf16.mxu0 %v1542_v8  ;;  %v1594_v35 = vld [vmem:[#allocation11 + $0x40] ss:$8 sps:$4 sm:$0xff]   ;;  %p1793_p3 = scmp.ne.s32.totalorder %s2282_s19, %s1792_s6  ;;  %s1880_s11 = smov [#allocation12]  }
  0xae   : > { %s1796_s22 = sshll.u32 %s1880_s11, 4  ;;  %s1797_s22 = int_to_ptr.vmem [resolvable:$false] %s1796_s22 }
  0xaf   : > { %p1794_p5 = pnand %p1793_p3, %p2085_p10  ;;  %s1798_s8 = scalar_lea.vmem %s1797_s22, 2048 }
  0xb0   : > { %570 = vmatpush1.bf16.msra.mxu0 %v1544_v9  ;;  %p1799_p12 = scmp.lt.s32.totalorder %s2282_s19, %s1797_s22  ;;  %p1800_p2 = scmp.lt.s32.totalorder %s1798_s8, %s1792_s6 }
  0xb1   : > { %571 = vmatprep.subr.bf16.mxu0 %v1545_v10  ;;  %p1795_p7 = pneg %p1794_p5 }
  0xb2   : > { %p1801_p1 = por %p1800_p2, %p1799_p12 }
  0xb4   : > { %572 = vmatpush1.bf16.msra.mxu0 %v1547_v11  ;;  %p1802_p13 = pnand %p1801_p1, %p1795_p7 }
  0xb5   : > { %573 = vmatprep.subr.bf16.mxu0 %v1548_v12 }
  0xb8   : > { %574 = vmatpush1.bf16.msra.mxu0 %v1550_v16 }
  0xb9   : > { %575 = vmatprep.subr.bf16.mxu0 %v1551_v17 }
  0xbc   : > { %576 = vmatpush1.bf16.msra.mxu0 %v1553_v18 }
  0xbd   : > { %577 = vmatprep.subr.bf16.mxu0 %v1554_v19 }
  0xc0   : > { %578 = vmatpush1.bf16.msra.mxu0 %v1556_v20 }
  0xc1   : > { %579 = vmatprep.subr.bf16.mxu0 %v1557_v21 }
  0xc4   : > { %580 = vmatpush1.bf16.msra.mxu0 %v1559_v22 }
  0xc5   : > { %581 = vmatprep.subr.bf16.mxu0 %v1560_v23 }
  0xc8   : > { %582 = vmatpush1.bf16.msra.mxu0 %v1562_v24 }
  0xc9   : > { %583 = vmatprep.subr.bf16.mxu0 %v1563_v25 }
  0xcc   : > { %584 = vmatpush1.bf16.msra.mxu0 %v1565_v26  ;;  %v1582_v26 = vld [vmem:[#allocation11] ss:$8 sps:$4 sm:$0xff]  }
  0xcd   : > { %585 = vmatprep.subr.bf16.mxu0 %v1566_v27  ;;  %v1584_v27 = vld [vmem:[#allocation11 + $0x4] ss:$8 sps:$4 sm:$0xff]  }
  0xd0   : > { %586 = vmatpush1.bf16.msra.mxu0 %v1568_v28  ;;  %v1587_v28 = vld [vmem:[#allocation11 + $0x14] ss:$8 sps:$4 sm:$0xff]  }
  0xd1   : > { %587 = vmatprep.subr.bf16.mxu0 %v1569_v29  ;;  %v1585_v29 = vld [vmem:[#allocation11 + $0x10] ss:$8 sps:$4 sm:$0xff]  }
  0xd4   : > { %588 = vmatpush1.bf16.msra.mxu0 %v1571_v30  ;;  %v1590_v30 = vld [vmem:[#allocation11 + $0x24] ss:$8 sps:$4 sm:$0xff]  }
  0xd5   : > { %589 = vmatprep.subr.bf16.mxu0 %v1572_v31  ;;  %v1588_v31 = vld [vmem:[#allocation11 + $0x20] ss:$8 sps:$4 sm:$0xff]  }
  0xd8   : > { %590 = vmatpush1.bf16.msra.mxu0 %v1574_v32  ;;  %v1593_v32 = vld [vmem:[#allocation11 + $0x34] ss:$8 sps:$4 sm:$0xff]  }
  0xd9   : > { %591 = vmatprep.subr.bf16.mxu0 %v1575_v33  ;;  %v1591_v33 = vld [vmem:[#allocation11 + $0x30] ss:$8 sps:$4 sm:$0xff]  }
  0xdc   : > { %592 = vmatpush1.bf16.msra.mxu0 %v1577_v34  ;;  %v1596_v34 = vld [vmem:[#allocation11 + $0x44] ss:$8 sps:$4 sm:$0xff]  }
  0xdf   : > { %594 = vmatmul.mubr.bf16.vlgmr.msra.gmra.mrb[0].mxu0 %v365_v39 }
  0xe0   : > { %603 = vmatprep.mubr.bf16.mxu0 %v368_v40 }
  0xe7   : > { %604 = vmatmul.mubr.bf16.gmra.mrb[4].mxu0 %v367_v43 }
  0xe8   : > { %1180 = vmatprep.mubr.bf16.mxu0 %v1879_v44 }
 0x1b2   : > { %v595_v45 = vpop.f32.mrb[0].mxu0 }
 0x1b3   : > { %v597_v46 = vpop.f32.mrb[1].mxu0 }
 0x1b4   : > { %v599_v47 = vpop.f32.mrb[2].mxu0 }
 0x1b5   : > { %v614_v48 = vpack.c.bf16 %v599_v47, %v595_v45  ;;  %v601_v49 = vpop.f32.mrb[3].mxu0 }
 0x1b6   : > { %v615_v50 = vpack.c.bf16 %v601_v49, %v597_v46 }
 0x1b8   : > { %639 = vmatprep.subr.bf16.mxu1 %v615_v50 }
 0x1b9   : > { %640 = vmatpush1.bf16.msra.mxu1 %v614_v48 }
 0x1ba   : > { %v605_v51 = vpop.f32.mrb[4].mxu0 }
 0x1bb   : > { %v607_v52 = vpop.f32.mrb[5].mxu0 }
 0x1bc   : > { %v609_v53 = vpop.f32.mrb[6].mxu0 }
 0x1bd   : > { %v616_v54 = vpack.c.bf16 %v609_v53, %v605_v51  ;;  %v611_v55 = vpop.f32.mrb[7].mxu0 }
 0x1be   : > { %v617_v56 = vpack.c.bf16 %v611_v55, %v607_v52 }
 0x1c0   : > { %641 = vmatprep.subr.bf16.mxu1 %v617_v56 }
 0x1c1   : > { %642 = vmatpush1.bf16.msra.mxu1 %v616_v54 }
 0x1c2   : > { %714 = vmatprep.subr.bf16.mxu1 %v615_v50 }
 0x1c4   : > { %1385 = vmatmul.mubr.msk.bf16.vlgmr.msra.gmra.mrb[0].mxu1 %vm632_vm0, %v1578_v57 }
 0x1c5   : > { %715 = vmatpush1.bf16.msra.mxu1 %v614_v48  ;;  %681 = vmatprep.mubr.bf16.mxu1 %v1879_v44 }
 0x1c6   : > { %716 = vmatprep.subr.bf16.mxu1 %v617_v56 }
 0x1c9   : > { %717 = vmatpush1.bf16.msra.mxu1 %v616_v54 }
 0x1ca   : > { %1071 = vmatprep.subr.bf16.mxu1 %v1584_v27 }
 0x1cc   : > { %1386 = vmatmul.mubr.msk.bf16.gmra.mrb[4].mxu1 %vm632_vm0, %v1579_v58 }
 0x1cd   : > { %746 = vmatprep.mubr.bf16.mxu1 %v1879_v44 }
 0x1d4   : > { %1389 = vmatmul.mubr.msk.bf16.vlgmr.msra.gmra.mrb[8].mxu1 %vm632_vm0, %v1580_v59 }
 0x1d5   : > { %756 = vmatprep.mubr.bf16.mxu1 %v1879_v44  ;;  %1072 = vmatpush1.bf16.msra.mxu1 %v1582_v26 }
 0x1d6   : > { %1073 = vmatprep.subr.bf16.mxu1 %v1587_v28 }
 0x1d9   : > { %1074 = vmatpush1.bf16.msra.mxu1 %v1585_v29 }
 0x1da   : > { %1075 = vmatprep.subr.bf16.mxu1 %v1590_v30  ;;  %v1597_v30 = vld [vmem:[#allocation11 + $0x50] ss:$8 sps:$4 sm:$0xff]  }
 0x1dc   : > { %1390 = vmatmul.mubr.msk.bf16.gmra.mrb[12].mxu1 %vm632_vm0, %v1581_v60 }
 0x1dd   : > { %1076 = vmatpush1.bf16.msra.mxu1 %v1588_v31  ;;  %v1599_v31 = vld [vmem:[#allocation11 + $0x54] ss:$8 sps:$4 sm:$0xff]  }
 0x1de   : > { %1077 = vmatprep.subr.bf16.mxu1 %v1593_v32  ;;  %v1602_v32 = vld [vmem:[#allocation11 + $0x64] ss:$8 sps:$4 sm:$0xff]  }
 0x1e1   : > { %1078 = vmatpush1.bf16.msra.mxu1 %v1591_v33  ;;  %v1600_v33 = vld [vmem:[#allocation11 + $0x60] ss:$8 sps:$4 sm:$0xff]  }
 0x1e2   : > { %1079 = vmatprep.subr.bf16.mxu1 %v1596_v34  ;;  %v1605_v34 = vld [vmem:[#allocation11 + $0x74] ss:$8 sps:$4 sm:$0xff]  }
 0x1e5   : > { %1080 = vmatpush1.bf16.msra.mxu1 %v1594_v35  ;;  %v1603_v35 = vld [vmem:[#allocation11 + $0x70] ss:$8 sps:$4 sm:$0xff]  }
 0x1e6   : > { %1081 = vmatprep.subr.bf16.mxu1 %v1599_v31 }
 0x1e9   : > { %1082 = vmatpush1.bf16.msra.mxu1 %v1597_v30 }
 0x1ea   : > { %1083 = vmatprep.subr.bf16.mxu1 %v1602_v32 }
 0x1ed   : > { %1084 = vmatpush1.bf16.msra.mxu1 %v1600_v33 }
 0x1ee   : > { %1085 = vmatprep.subr.bf16.mxu1 %v1605_v34 }
 0x1f1   : > { %1086 = vmatpush1.bf16.msra.mxu1 %v1603_v35 }
 0x297   : > { %v2174_v61 = vpop.f32.mrb[0].mxu1 }
 0x298   : > { %v2176_v62 = vpop.f32.mrb[1].mxu1 }
 0x299   : > { %v2178_v63 = vpop.f32.mrb[2].mxu1 }
 0x29a   : > { %v2180_v0 = vpop.f32.mrb[3].mxu1 }
 0x29f   : > { %v2182_v1 = vpop.f32.mrb[4].mxu1 }
 0x2a0   : > { %v2184_v2 = vpop.f32.mrb[5].mxu1 }
 0x2a1   : > { %v2186_v3 = vpop.f32.mrb[6].mxu1 }
 0x2a2   : > { %v2188_v4 = vpop.f32.mrb[7].mxu1 }
 0x2a7   : > { %v748_v6 = vpop.f32.mrb[8].mxu1 }
 0x2a8   : > { %v2190_v7 = vadd.f32 %v748_v6, %v697_v5  ;;  %v750_v8 = vpop.f32.mrb[9].mxu1 }
 0x2a9   : > { %v2192_v9 = vadd.f32 %v750_v8, %v697_v5  ;;  %v752_v10 = vpop.f32.mrb[10].mxu1 }
 0x2aa   : > { %v754_v11 = vpop.f32.mrb[11].mxu1  ;;  %v2194_v12 = vadd.f32 %v752_v10, %v697_v5 }
 0x2ab   : > { %v2196_v13 = vadd.f32 %v754_v11, %v697_v5  ;;  %v767_v14 = vmax.f32 %v2190_v7, %v2192_v9 }
 0x2ad   : > { %768 = vmax.xlane.f32.xlu0 %v767_v14  ;;  %v770_v16 = vmax.f32 %v2194_v12, %v2196_v13  ;;  %v846_v30 = vmax.f32 %v2196_v13, 0.0 }
 0x2af   : > { %v758_v15 = vpop.f32.mrb[12].mxu1 }
 0x2b0   : > { %v2202_v17 = vadd.f32 %v758_v15, %v697_v5  ;;  %v760_v18 = vpop.f32.mrb[13].mxu1 }
 0x2b1   : > { %v2204_v19 = vadd.f32 %v760_v18, %v697_v5  ;;  %v762_v20 = vpop.f32.mrb[14].mxu1  ;;  %771 = vmax.xlane.f32.xlu0 %v770_v16 }
 0x2b2   : > { %v764_v21 = vpop.f32.mrb[15].mxu1  ;;  %v2206_v22 = vadd.f32 %v762_v20, %v697_v5  ;;  %v847_v32 = vmax.f32 %v2202_v17, 0.0 }
 0x2b3   : > { %v2208_v23 = vadd.f32 %v764_v21, %v697_v5  ;;  %v773_v24 = vmax.f32 %v2202_v17, %v2204_v19  ;;  %v848_v33 = vmax.f32 %v2204_v19, 0.0 }
 0x2b4   : > { %v849_v34 = vmax.f32 %v2206_v22, 0.0 }
 0x2b5   : > { %774 = vmax.xlane.f32.xlu1 %v773_v24  ;;  %v776_v25 = vmax.f32 %v2206_v22, %v2208_v23  ;;  %v850_v35 = vmax.f32 %v2208_v23, 0.0 }
 0x2b9   : > { %777 = vmax.xlane.f32.xlu1 %v776_v25 }
 0x33a   : > { %v769_v36 = vpop.xlane.xlu0 %768 }
 0x33e   : > { %v772_v38 = vpop.xlane.xlu0 %771 }
 0x33f   : > { %v779_v40 = vmax.f32 %v769_v36, %v772_v38  ;;  %v1608_v36 = vld [vmem:[#allocation11 + $0x84] ss:$8 sps:$4 sm:$0xff]   ;;  %v1611_v38 = vld [vmem:[#allocation11 + $0x94] ss:$8 sps:$4 sm:$0xff]  }
 0x340   : > { %1087 = vmatprep.subr.bf16.mxu1 %v1608_v36 }
 0x342   : > { %v775_v37 = vpop.xlane.xlu1 %774 }
 0x346   : > { %v778_v39 = vpop.xlane.xlu1 %777 }
 0x347   : > { %v780_v41 = vmax.f32 %v775_v37, %v778_v39  ;;  %v1606_v37 = vld [vmem:[#allocation11 + $0x80] ss:$8 sps:$4 sm:$0xff]   ;;  %v1609_v39 = vld [vmem:[#allocation11 + $0x90] ss:$8 sps:$4 sm:$0xff]  }
 0x348   : > { %1088 = vmatpush1.bf16.msra.mxu1 %v1606_v37 }
 0x349   : > { %v781_v42 = vmax.f32 %v779_v40, %v780_v41  ;;  %1089 = vmatprep.subr.bf16.mxu1 %v1611_v38  ;;  %v1614_v40 = vld [vmem:[#allocation11 + $0xa4] ss:$8 sps:$4 sm:$0xff]   ;;  %v1612_v41 = vld [vmem:[#allocation11 + $0xa0] ss:$8 sps:$4 sm:$0xff]  }
 0x34b   : > { %v782_v43 = vrot.slane %v781_v42, 4 }
 0x34c   : > { %1090 = vmatpush1.bf16.msra.mxu1 %v1609_v39 }
 0x34d   : > { %v783_v45 = vmax.f32 %v781_v42, %v782_v43  ;;  %1091 = vmatprep.subr.bf16.mxu1 %v1614_v40  ;;  %v1617_v42 = vld [vmem:[#allocation11 + $0xb4] ss:$8 sps:$4 sm:$0xff]   ;;  %v1615_v43 = vld [vmem:[#allocation11 + $0xb0] ss:$8 sps:$4 sm:$0xff]  }
 0x34f   : > { %v784_v46 = vrot.slane %v783_v45, 2 }
 0x350   : > { %1092 = vmatpush1.bf16.msra.mxu1 %v1612_v41 }
 0x351   : > { %v785_v47 = vmax.f32 %v783_v45, %v784_v46  ;;  %1093 = vmatprep.subr.bf16.mxu1 %v1617_v42  ;;  %v1620_v45 = vld [vmem:[#allocation11 + $0xc4] ss:$8 sps:$4 sm:$0xff]   ;;  %v1618_v46 = vld [vmem:[#allocation11 + $0xc0] ss:$8 sps:$4 sm:$0xff]  }
 0x353   : > { %v786_v48 = vrot.slane %v785_v47, 1 }
 0x354   : > { %1094 = vmatpush1.bf16.msra.mxu1 %v1615_v43 }
 0x355   : > { %v787_v49 = vmax.f32 %v785_v47, %v786_v48  ;;  %v1623_v47 = vld [vmem:[#allocation11 + $0xd4] ss:$8 sps:$4 sm:$0xff]   ;;  %1095 = vmatprep.subr.bf16.mxu1 %v1620_v45  ;;  %v1621_v48 = vld [vmem:[#allocation11 + $0xd0] ss:$8 sps:$4 sm:$0xff]  }
 0x357   : > { %v790_v50 = vsub.f32 %v2194_v12, %v787_v49  ;;  %v791_v51 = vsub.f32 %v2196_v13, %v787_v49  ;;  %v788_v52 = vsub.f32 %v2190_v7, %v787_v49  ;;  %v789_v53 = vsub.f32 %v2192_v9, %v787_v49 }
 0x358   : > { %v794_v54 = vsub.f32 %v2206_v22, %v787_v49  ;;  %v795_v55 = vsub.f32 %v2208_v23, %v787_v49  ;;  %v792_v59 = vsub.f32 %v2202_v17, %v787_v49  ;;  %v793_v5 = vsub.f32 %v2204_v19, %v787_v49  ;;  %1096 = vmatpush1.bf16.msra.mxu1 %v1618_v46  ;;  %v1626_v49 = vld [vmem:[#allocation11 + $0xe4] ss:$8 sps:$4 sm:$0xff]  }
 0x359   : > { %v800_v56 = vmul.f32 1.442695, %v790_v50  ;;  %v802_v57 = vmul.f32 1.442695, %v791_v51  ;;  %v796_v58 = vmul.f32 1.442695, %v788_v52  ;;  %1097 = vmatprep.subr.bf16.mxu1 %v1623_v47 }
 0x35a   : > { %v798_v60 = vmul.f32 1.442695, %v789_v53  ;;  %v808_v6 = vmul.f32 1.442695, %v794_v54  ;;  %v810_v8 = vmul.f32 1.442695, %v795_v55 }
 0x35b   : > { %1632 = vpow2.f32 %v800_v56  ;;  %v804_v10 = vmul.f32 1.442695, %v792_v59  ;;  %v806_v11 = vmul.f32 1.442695, %v793_v5  ;;  %v1624_v50 = vld [vmem:[#allocation11 + $0xe0] ss:$8 sps:$4 sm:$0xff]  }
 0x35c   : > { %1634 = vpow2.f32 %v802_v57  ;;  %1098 = vmatpush1.bf16.msra.mxu1 %v1621_v48  ;;  %v1629_v51 = vld [vmem:[#allocation11 + $0xf4] ss:$8 sps:$4 sm:$0xff]   ;;  %v1627_v52 = vld [vmem:[#allocation11 + $0xf0] ss:$8 sps:$4 sm:$0xff]  }
 0x35d   : > { %1636 = vpow2.f32 %v796_v58  ;;  %1099 = vmatprep.subr.bf16.mxu1 %v1626_v49 }
 0x35e   : > { %1638 = vpow2.f32 %v798_v60 }
 0x35f   : > { %1640 = vpow2.f32 %v808_v6 }
 0x360   : > { %1642 = vpow2.f32 %v810_v8  ;;  %1100 = vmatpush1.bf16.msra.mxu1 %v1624_v50 }
 0x361   : > { %1644 = vpow2.f32 %v804_v10  ;;  %1101 = vmatprep.subr.bf16.mxu1 %v1629_v51 }
 0x362   : > { %1646 = vpow2.f32 %v806_v11 }
 0x364   : > { %1102 = vmatpush1.bf16.msra.mxu1 %v1627_v52 }
 0x365   : > { %v2222_v14 = vpop.eup %1632 }
 0x366   : > { %v2224_v15 = vpop.eup %1634 }
 0x367   : > { %v2226_v16 = vpop.eup %1636  ;;  %v815_v18 = vadd.f32 %v2224_v15, %v2222_v14 }
 0x368   : > { %v2230_v20 = vpop.eup %1638 }
 0x369   : > { %v2232_v21 = vpop.eup %1640  ;;  %816 = vadd.xlane.f32.xlu1 %v815_v18  ;;  %v812_v24 = vadd.f32 %v2230_v20, %v2226_v16 }
 0x36a   : > { %v2236_v25 = vpop.eup %1642 }
 0x36b   : > { %v2238_v26 = vpop.eup %1644  ;;  %813 = vadd.xlane.f32.xlu0 %v812_v24  ;;  %v821_v27 = vadd.f32 %v2236_v25, %v2232_v21  ;;  %v843_v24 = vmax.f32 %v2190_v7, 0.0 }
 0x36c   : > { %v2242_v28 = vpop.eup %1646 }
 0x36d   : > { %822 = vadd.xlane.f32.xlu1 %v821_v27  ;;  %v818_v29 = vadd.f32 %v2242_v28, %v2238_v26  ;;  %v844_v27 = vmax.f32 %v2192_v9, 0.0 }
 0x36f   : > { %819 = vadd.xlane.f32.xlu0 %v818_v29  ;;  %v845_v29 = vmax.f32 %v2194_v12, 0.0 }
 0x3f6   : > { %v817_v53 = vpop.xlane.xlu1 %816 }
 0x3f8   : > { %v814_v54 = vpop.xlane.xlu0 %813 }
 0x3f9   : > { %v824_v55 = vadd.f32 %v817_v53, %v814_v54 }
 0x3fa   : > { %v823_v58 = vpop.xlane.xlu1 %822 }
 0x3fc   : > { %v820_v56 = vpop.xlane.xlu0 %819 }
 0x3fd   : > { %v825_v57 = vadd.f32 %v824_v55, %v820_v56 }
 0x3ff   : > { %v826_v59 = vadd.f32 %v825_v57, %v823_v58 }
 0x401   : > { %v827_v60 = vrot.slane %v826_v59, 4 }
 0x403   : > { %v828_v5 = vadd.f32 %v827_v60, %v826_v59 }
 0x405   : > { %v829_v6 = vrot.slane %v828_v5, 2 }
 0x407   : > { %v830_v8 = vadd.f32 %v829_v6, %v828_v5  ;;  %v1630_v5 = vld [vmem:[%s2335_s4] sm:$0xff]   ;;  %v1631_v6 = vld [vmem:[%s2335_s4 + $0x8] sm:$0xff]  }
 0x409   : > { %v831_v10 = vrot.slane %v830_v8, 1 }
 0x40b   : > { %v832_v11 = vadd.f32 %v831_v10, %v830_v8 }
 0x40d   : > { %1648 = vrcp.f32 %v832_v11 }
 0x417   : > { %v1649_v18 = vpop.eup %1648 }
 0x418   : > { %v834_v31 = vmul.f32 4.0, %v1649_v18 }
 0x41a   : > { %v836_v36 = vmul.f32 %v2230_v20, %v834_v31  ;;  %v838_v37 = vmul.f32 %v2224_v15, %v834_v31  ;;  %v835_v7 = vmul.f32 %v2226_v16, %v834_v31  ;;  %v837_v9 = vmul.f32 %v2222_v14, %v834_v31 }
 0x41b   : > { %v840_v12 = vmul.f32 %v2242_v28, %v834_v31  ;;  %v842_v13 = vmul.f32 %v2236_v25, %v834_v31  ;;  %v839_v17 = vmul.f32 %v2238_v26, %v834_v31  ;;  %v841_v19 = vmul.f32 %v2232_v21, %v834_v31 }
 0x41c   : > { %v852_v38 = vsub.f32 1.0, %v836_v36  ;;  %v854_v22 = vsub.f32 1.0, %v838_v37  ;;  %v851_v39 = vsub.f32 1.0, %v835_v7  ;;  %v853_v23 = vsub.f32 1.0, %v837_v9 }
 0x41d   : > { %v856_v40 = vsub.f32 1.0, %v840_v12  ;;  %v858_v20 = vsub.f32 1.0, %v842_v13  ;;  %v855_v41 = vsub.f32 1.0, %v839_v17  ;;  %v857_v15 = vsub.f32 1.0, %v841_v19 }
 0x41e   : > { %v860_v42 = vadd.f32 %v852_v38, %v844_v27  ;;  %v862_v16 = vadd.f32 %v854_v22, %v846_v30  ;;  %v859_v43 = vadd.f32 %v851_v39, %v843_v24  ;;  %v861_v14 = vadd.f32 %v853_v23, %v845_v29 }
 0x41f   : > { %v864_v45 = vadd.f32 %v856_v40, %v848_v33  ;;  %v866_v28 = vadd.f32 %v858_v20, %v850_v35  ;;  %v863_v46 = vadd.f32 %v855_v41, %v847_v32  ;;  %v865_v25 = vadd.f32 %v857_v15, %v849_v34 }
 0x420   : > { %v868_v26 = vmul.f32 %v860_v42, %v2176_v62  ;;  %v870_v21 = vmul.f32 %v862_v16, %v2180_v0  ;;  %v867_v47 = vmul.f32 %v859_v43, %v2174_v61  ;;  %v869_v48 = vmul.f32 %v861_v14, %v2178_v63 }
 0x421   : > { %v872_v49 = vmul.f32 %v864_v45, %v2184_v2  ;;  %v874_v50 = vmul.f32 %v866_v28, %v2188_v4  ;;  %v871_v51 = vmul.f32 %v863_v46, %v2182_v1  ;;  %v873_v52 = vmul.f32 %v865_v25, %v2186_v3 }
 0x422   : > { %v876_v53 = vpack.c.bf16 %v870_v21, %v868_v26  ;;  %v875_v54 = vpack.c.bf16 %v869_v48, %v867_v47 }
 0x423   : > { %v878_v55 = vpack.c.bf16 %v874_v50, %v872_v49  ;;  %v877_v56 = vpack.c.bf16 %v873_v52, %v871_v51 }
 0x424   : > { %1103 = vmatprep.mubr.bf16.mxu1 %v876_v53 }
 0x425   : > { %1104 = vmatmul.mubr.bf16.vlgmr.msra.gmra.mrb[16].mxu1 %v875_v54 }
 0x426   : > { %1113 = vmatprep.mubr.bf16.mxu1 %v878_v55 }
 0x42d   : > { %1114 = vmatmul.mubr.bf16.gmra.mrb[20].mxu1 %v877_v56 }
 0x4f8   : > { %v1105_v62 = vpop.f32.mrb[16].mxu1 }
 0x4f9   : > { %v1107_v61 = vpop.f32.mrb[17].mxu1 }
 0x4fa   : > { %v1109_v0 = vpop.f32.mrb[18].mxu1 }
 0x4fb   : > { %v1128_v63 = vpack.c.bf16 %v1109_v0, %v1105_v62  ;;  %v1111_v57 = vpop.f32.mrb[19].mxu1 }
 0x4fc   : > { %v1129_v2 = vpack.c.bf16 %v1111_v57, %v1107_v61 }
 0x4fe   : > { %1148 = vmatprep.subr.bf16.mxu0 %v1129_v2 }
 0x4ff   : > { %1149 = vmatpush1.bf16.msra.mxu0 %v1128_v63 }
 0x500   : > { %v1115_v1 = vpop.f32.mrb[20].mxu1 }
 0x501   : > { %v1117_v4 = vpop.f32.mrb[21].mxu1 }
 0x502   : > { %v1119_v3 = vpop.f32.mrb[22].mxu1 }
 0x503   : > { %v1130_v58 = vpack.c.bf16 %v1119_v3, %v1115_v1  ;;  %v1121_v59 = vpop.f32.mrb[23].mxu1 }
 0x504   : > { %v1131_v60 = vpack.c.bf16 %v1121_v59, %v1117_v4 }
 0x506   : > { %1150 = vmatprep.subr.bf16.mxu0 %v1131_v60 }
 0x507   : > { %1151 = vmatpush1.bf16.msra.mxu0 %v1130_v58 }
 0x50a   : > { %1425 = vmatmul.mubr.msk.bf16.vlgmr.msra.gmra.mrb[8].mxu0 %vm632_vm0, %v1630_v5 }
 0x50b   : > { %1190 = vmatprep.mubr.bf16.mxu0 %v1879_v44 }
 0x512   : > { %1426 = vmatmul.mubr.msk.bf16.gmra.mrb[12].mxu0 %vm632_vm0, %v1631_v6 }
 0x5dd   : > { %v1182_v8 = vpop.f32.mrb[8].mxu0 }
 0x5de   : > { %1201 = vst [vmem:[%s355_s14] sm:$0xff] %v1182_v8  ;;  %v1184_v10 = vpop.f32.mrb[9].mxu0 }
 0x5df   : > { %1202 = vst [vmem:[%s355_s14 + $0x8] sm:$0xff] %v1184_v10  ;;  %v1186_v11 = vpop.f32.mrb[10].mxu0 }
 0x5e0   : > { %1203 = vst [vmem:[%s355_s14 + $0x10] sm:$0xff] %v1186_v11  ;;  %v1188_v18 = vpop.f32.mrb[11].mxu0 }
 0x5e1   : > { %1204 = vst [vmem:[%s355_s14 + $0x18] sm:$0xff] %v1188_v18 }
 0x5e5   : > { %v1192_v44 = vpop.f32.mrb[12].mxu0 }
 0x5e6   : > { %1205 = vst [vmem:[%s355_s14 + $0x20] sm:$0xff] %v1192_v44  ;;  %v1194_v24 = vpop.f32.mrb[13].mxu0 }
 0x5e7   : > { %1206 = vst [vmem:[%s355_s14 + $0x28] sm:$0xff] %v1194_v24  ;;  %v1196_v27 = vpop.f32.mrb[14].mxu0 }
 0x5e8   : > { %1207 = vst [vmem:[%s355_s14 + $0x30] sm:$0xff] %v1196_v27  ;;  %v1198_v29 = vpop.f32.mrb[15].mxu0 }
 0x5e9   : > { %1208 = vst [vmem:[%s355_s14 + $0x38] sm:$0xff] %v1198_v29 }
 0x5ea   : > { %1805 = shalt.err (!%p1802_p13)
}
 0x5eb   : > { %s1806_s10 = scalar_lea.hbm %s2287_s13, 1024  ;;  %s1810_s17 = scalar_lea.hbm %s2338_s7, 2048 }
 0x5ec   : > { %p1807_p9 = scmp.ne.s32.totalorder %s2287_s13, %s1806_s10  ;;  %p1811_p4 = scmp.lt.u32.totalorder %s2287_s13, %s2338_s7 }
 0x5ed   : > { %p1812_p8 = scmp.lt.u32.totalorder %s1810_s17, %s1806_s10  ;;  %p1814_p3 = scmp.lt.u32.totalorder %s1806_s10, %s2287_s13 }
 0x5ee   : > { %p1808_p0 = pnand %p1807_p9, %p2085_p10 }
 0x5ef   : > { %p1813_p6 = por %p1812_p8, %p1811_p4 }
 0x5f0   : > { %p1809_p11 = pneg %p1808_p0 }
 0x5f1   : > { %p1815_p5 = por %p1814_p3, %p1813_p6 }
 0x5f3   : > { %p1816_p7 = pnand %p1815_p5, %p1809_p11 }
 0x5f5   : > { %1819 = shalt.err (!%p1816_p7)
}
 0x5f6   : > { %s1881_s18 = smov 256   ;;  %s1882_s16 = smov 16  }
 0x5f7   : > { %1452 = dma.vmem_to_hbm [thread:$0]  (%p2085_p10), %s2282_s19, 1024, %s2287_s13, %s1210_s15, %s1881_s18, %s1881_s18, %s1882_s16  }
 0x5f8 PF: > { %s1238_s6 = sand.u32 1, %s1854_s26   ;;  %p2356_p12 = scmp.ne.s32.totalorder %s2343_s9, 0 }
 0x5f9   : > { %p2357_p2 = scmp.ge.s32.totalorder %s1866_s29, 2  ;;  %s1239_s11 = scalar_lea.sflag [#allocation5], %s1238_s6 }
 0x5fb   : > { %p1472_p1 = pnand %p2357_p2, %p2356_p12 }
 0x5fd   : > { %1849 = dma.done.wait (!%p1472_p1), %s1239_s11, 1024  }
 0x5fe   : > { %1851 = vsyncadd (!%p1472_p1), %s1239_s11, 4294966272  ;;  %p23_p13 = scmp.ge.s32.totalorder %s2075_s23, 4   ;;  %s2358_s26 = smov %s1858_s27 }
 0x5ff   : > { %s2359_s27 = smov %s1862_s28  ;;  %s2360_s28 = smov %s2091_s21 }
 0x600   : > { %s2361_s29 = smov %s2075_s23  ;;  %25 = sbr.rel (!%p23_p13) target bundleno = 9 (0x9), region = 109 }
 0x607   :  { %1244 = vsyncpa [#allocation4], 1 }
 0x608   :  { %1246 = vsyncpa [#allocation4 + $0x1], 1 }
 0x609   :  { %1247 = vsyncpa [#allocation7], 1 }
 0x60a   :  { %1248 = vsyncpa [#allocation10], 1 }
 0x60b   :  { %1249 = vsyncpa [#allocation5], 1 }
 0x60c   :  { %1251 = vsyncpa [#allocation5 + $0x1], 1 }

</bundles_post_ra>
